<compile_context>
chip_gen: v7x
topology: tpu7x:2x2x1
jax: 0.10.0
libtpu: 0.0.40
codegen_flags: <defaults>
</compile_context>

<pallas_src>
import math

import jax
import jax.numpy as jnp
from jax.experimental import pallas as pl
from jax.experimental.pallas import tpu as pltpu


# -----------------------------------------------------------------------------
# Kernel: one batch tile through all 5 layers. Weights bf16, biases f32,
# activations accumulate in f32 and are cast to bf16 only to feed the MXU.
# -----------------------------------------------------------------------------
def dqn_kernel(x_ref,
               w1_ref, b1_ref,
               w2_ref, b2_ref,
               w3_ref, b3_ref,
               w4_ref, b4_ref,
               w5_ref, b5_ref,
               out_ref):
    h = jnp.dot(x_ref[...], w1_ref[...],
                preferred_element_type=jnp.float32) + b1_ref[...]
    h = jnp.maximum(h, 0.0)

    h = jnp.dot(h.astype(jnp.bfloat16), w2_ref[...],
                preferred_element_type=jnp.float32) + b2_ref[...]
    h = jnp.maximum(h, 0.0)

    h = jnp.dot(h.astype(jnp.bfloat16), w3_ref[...],
                preferred_element_type=jnp.float32) + b3_ref[...]
    h = jnp.maximum(h, 0.0)

    h = jnp.dot(h.astype(jnp.bfloat16), w4_ref[...],
                preferred_element_type=jnp.float32) + b4_ref[...]
    h = jnp.maximum(h, 0.0)

    # head: no activation; store bf16 (out_ref dtype) to halve write traffic
    out = jnp.dot(h.astype(jnp.bfloat16), w5_ref[...],
                  preferred_element_type=jnp.float32) + b5_ref[...]
    out_ref[...] = out.astype(out_ref.dtype)


# -----------------------------------------------------------------------------
# Helpers
# -----------------------------------------------------------------------------
def _round_up(n, m):
    return ((n + m - 1) // m) * m


def _pad2d(a, rows, cols):
    return jnp.pad(a, ((0, rows - a.shape[0]), (0, cols - a.shape[1])))


def _device_kind():
    try:
        return jax.devices()[0].device_kind.lower()
    except Exception:
        return ""


# -----------------------------------------------------------------------------
# One-time parameter packing (do NOT call per forward): pads weights/biases to
# lane-friendly shapes and casts weights to bf16. Zero padding is numerically
# inert (padded K rows / N cols contribute nothing; padded cols sliced off).
# -----------------------------------------------------------------------------
def pack_dqn_params(params):
    """params: list of 5 (W, b), W (in, out), b (1, out) or (out,)."""
    n_in = params[0][0].shape[0]
    n_out = params[-1][0].shape[1]

    in_pad = _round_up(max(n_in, 128), 128)
    h4_pad = 128                                  # fc4 width 64 -> 128 lanes
    out_pad = _round_up(max(n_out, 128), 128)     # head width -> 128 lanes

    dims = [(in_pad, 512), (512, 256), (256, 128), (128, h4_pad), (h4_pad, out_pad)]

    flat = []
    for (w, b), (din, dout) in zip(params, dims):
        flat.append(_pad2d(jnp.asarray(w), din, dout).astype(jnp.bfloat16))
        flat.append(_pad2d(jnp.asarray(b).reshape(1, -1), 1, dout)
                    .astype(jnp.float32))

    return {
        "flat": tuple(flat),
        "n_in": n_in,
        "n_out": n_out,
        "in_pad": in_pad,
        "out_pad": out_pad,
    }


def _choose_tb(B, tb):
    """Batch-tile selection (see header for rationale)."""
    kind = _device_kind()
    if B <= 128:
        # tiny batch: full-array block, bf16 needs only 16 sublanes
        return _round_up(max(B, 16), 16)
    # large batch: multiple of 128, capped
    tb = max(128, (int(tb) // 128) * 128)
    if "v5" in kind:
        tb = min(tb, 512)          # v5e: 16 MiB scoped-VMEM default
    TB = min(tb, _round_up(B, 128))
    # v7x (2 TCs/chip): make sure the parallel grid has >= 2 steps so both
    # TensorCores get work for moderate batches.
    if "v7" in kind and B > 256 and _round_up(B, TB) // TB < 2:
        TB = max(128, _round_up(-(-B // 2), 128))
    return TB


# -----------------------------------------------------------------------------
# Forward: grid over the batch dimension; weights use constant index_maps so
# they are DMA'd once and stay VMEM-resident across every grid step.
# -----------------------------------------------------------------------------
def dqn_forward(x, packed, tb=512):
    """x: (B, n_inputs) f32; packed: output of pack_dqn_params."""
    B, n_in = x.shape
    assert n_in == packed["n_in"], "input width mismatch with packed params"
    flat = packed["flat"]
    in_pad = packed["in_pad"]
    out_pad = packed["out_pad"]
    n_out = packed["n_out"]

    TB = _choose_tb(B, tb)
    B_pad = _round_up(B, TB)
    xp = _pad2d(x, B_pad, in_pad).astype(jnp.bfloat16)

    in_specs = [pl.BlockSpec((TB, in_pad), lambda i: (i, 0))]
    for arr in flat:
        # full-array block, constant index -> fetched once, resident in VMEM
        in_specs.append(pl.BlockSpec(arr.shape, lambda i: (0, 0)))

    out = pl.pallas_call(
        dqn_kernel,
        out_shape=jax.ShapeDtypeStruct((B_pad, out_pad), jnp.bfloat16),
        grid=(B_pad // TB,),
        in_specs=in_specs,
        out_specs=pl.BlockSpec((TB, out_pad), lambda i: (i, 0)),
        compiler_params=pltpu.CompilerParams(
            dimension_semantics=("parallel",)),
    )(xp, *flat)

    return out[:B, :n_out].astype(jnp.float32)


# -----------------------------------------------------------------------------
# Deterministic parameter init (mimics PyTorch nn.Linear default:
# U(-1/sqrt(fan_in), 1/sqrt(fan_in))). Weights stored (in, out) = W^T.
# -----------------------------------------------------------------------------
def init_dqn_params(key, n_inputs, n_outputs):
    sizes = [n_inputs, 512, 256, 128, 64, n_outputs]
    params = []
    for i in range(len(sizes) - 1):
        fan_in, fan_out = sizes[i], sizes[i + 1]
        key, kw, kb = jax.random.split(key, 3)
        bound = 1.0 / math.sqrt(fan_in)
        w = jax.random.uniform(kw, (fan_in, fan_out), jnp.float32, -bound, bound)
        b = jax.random.uniform(kb, (1, fan_out), jnp.float32, -bound, bound)
        params.append((w, b))
    return params


def dqn_reference(x, params):
    """Pure-JAX reference mirroring the kernel's bf16-weight / f32-accum math
    (head output rounded through bf16, like the kernel's bf16 store)."""
    h = x.astype(jnp.bfloat16)
    for idx, (w, b) in enumerate(params):
        h = jnp.dot(h, w.astype(jnp.bfloat16),
                    preferred_element_type=jnp.float32) + b
        if idx < len(params) - 1:
            h = jnp.maximum(h, 0.0).astype(jnp.bfloat16)
    return h.astype(jnp.bfloat16).astype(jnp.float32)


if __name__ == "__main__":
    key = jax.random.PRNGKey(0)
    key, kx1, kx2 = jax.random.split(key, 3)

    n_inputs = 16   # small laser-scan-style observation
    n_outputs = 8   # discrete actions

    params = init_dqn_params(key, n_inputs, n_outputs)
    packed = pack_dqn_params(params)   # one-time packing (hoisted out of fwd)

    # tiny-batch (inference-style) case
    batch = 4
    x = jax.random.normal(kx1, (batch, n_inputs), dtype=jnp.float32)
    out = jax.block_until_ready(dqn_forward(x, packed))
    ref = dqn_reference(x, params)
    assert out.shape == (batch, n_outputs)
    assert bool(jnp.allclose(out, ref, atol=1e-2, rtol=1e-2)), (
        "max abs err = %s" % float(jnp.max(jnp.abs(out - ref))))

    # larger-batch case to exercise the >128-row tiling path
    batch2 = 160
    x2 = jax.random.normal(kx2, (batch2, n_inputs), dtype=jnp.float32)
    out2 = jax.block_until_ready(dqn_forward(x2, packed))
    ref2 = dqn_reference(x2, params)
    assert out2.shape == (batch2, n_outputs)
    assert bool(jnp.allclose(out2, ref2, atol=1e-2, rtol=1e-2)), (
        "max abs err = %s" % float(jnp.max(jnp.abs(out2 - ref2))))

    print("KERNEL_OK")
</pallas_src>

<mosaic_0001>
module attributes {stable_mosaic.version = 11 : i64} {
  func.func @dqn_kernel(%arg0: i32, %arg1: memref<16x128xbf16, #tpu.memory_space<vmem>>, %arg2: memref<128x512xbf16, #tpu.memory_space<vmem>>, %arg3: memref<1x512xf32, #tpu.memory_space<vmem>>, %arg4: memref<512x256xbf16, #tpu.memory_space<vmem>>, %arg5: memref<1x256xf32, #tpu.memory_space<vmem>>, %arg6: memref<256x128xbf16, #tpu.memory_space<vmem>>, %arg7: memref<1x128xf32, #tpu.memory_space<vmem>>, %arg8: memref<128x128xbf16, #tpu.memory_space<vmem>>, %arg9: memref<1x128xf32, #tpu.memory_space<vmem>>, %arg10: memref<128x128xbf16, #tpu.memory_space<vmem>>, %arg11: memref<1x128xf32, #tpu.memory_space<vmem>>, %arg12: memref<16x128xbf16, #tpu.memory_space<vmem>>) attributes {dimension_semantics = [#tpu.dimension_semantics<parallel>], iteration_bounds = array<i64: 1>, scalar_prefetch = 0 : i64, scratch_operands = 0 : i64, tpu.core_type = #tpu.core_type<tc>, window_params = [{transform_indices = @transform_0, window_bounds = array<i64: 16, 128>}, {pipeline_mode = #tpu.pipeline_mode<synchronous>, transform_indices = @transform_1, window_bounds = array<i64: 128, 512>}, {pipeline_mode = #tpu.pipeline_mode<synchronous>, transform_indices = @transform_2, window_bounds = array<i64: 1, 512>}, {pipeline_mode = #tpu.pipeline_mode<synchronous>, transform_indices = @transform_3, window_bounds = array<i64: 512, 256>}, {pipeline_mode = #tpu.pipeline_mode<synchronous>, transform_indices = @transform_4, window_bounds = array<i64: 1, 256>}, {pipeline_mode = #tpu.pipeline_mode<synchronous>, transform_indices = @transform_5, window_bounds = array<i64: 256, 128>}, {pipeline_mode = #tpu.pipeline_mode<synchronous>, transform_indices = @transform_6, window_bounds = array<i64: 1, 128>}, {pipeline_mode = #tpu.pipeline_mode<synchronous>, transform_indices = @transform_7, window_bounds = array<i64: 128, 128>}, {pipeline_mode = #tpu.pipeline_mode<synchronous>, transform_indices = @transform_8, window_bounds = array<i64: 1, 128>}, {pipeline_mode = #tpu.pipeline_mode<synchronous>, transform_indices = @transform_9, window_bounds = array<i64: 128, 128>}, {pipeline_mode = #tpu.pipeline_mode<synchronous>, transform_indices = @transform_10, window_bounds = array<i64: 1, 128>}, {transform_indices = @transform_11, window_bounds = array<i64: 16, 128>}]} {
    %c0 = arith.constant 0 : index
    %c0_0 = arith.constant 0 : index
    %0 = vector.load %arg1[%c0, %c0_0] : memref<16x128xbf16, #tpu.memory_space<vmem>>, vector<16x128xbf16>
    %c0_1 = arith.constant 0 : index
    %c0_2 = arith.constant 0 : index
    %1 = vector.load %arg2[%c0_1, %c0_2] : memref<128x512xbf16, #tpu.memory_space<vmem>>, vector<128x512xbf16>
    %cst = arith.constant dense<0.000000e+00> : vector<16x512xf32>
    %2 = tpu.matmul %0, %1, %cst {dimension_numbers = #tpu.dot_dimension_numbers<[1], [0], [0], [1], [0, 0, 1, 1], [], []>} : vector<16x128xbf16>, vector<128x512xbf16>, vector<16x512xf32> -> vector<16x512xf32>
    %c0_3 = arith.constant 0 : index
    %c0_4 = arith.constant 0 : index
    %3 = vector.load %arg3[%c0_3, %c0_4] : memref<1x512xf32, #tpu.memory_space<vmem>>, vector<1x512xf32>
    %4 = vector.broadcast %3 : vector<1x512xf32> to vector<16x512xf32>
    %5 = arith.addf %2, %4 : vector<16x512xf32>
    %cst_5 = arith.constant 0.000000e+00 : f32
    %6 = vector.broadcast %cst_5 : f32 to vector<16x512xf32>
    %7 = arith.maximumf %5, %6 : vector<16x512xf32>
    %8 = arith.truncf %7 : vector<16x512xf32> to vector<16x512xbf16>
    %c0_6 = arith.constant 0 : index
    %c0_7 = arith.constant 0 : index
    %9 = vector.load %arg4[%c0_6, %c0_7] : memref<512x256xbf16, #tpu.memory_space<vmem>>, vector<512x256xbf16>
    %cst_8 = arith.constant dense<0.000000e+00> : vector<16x256xf32>
    %10 = tpu.matmul %8, %9, %cst_8 {dimension_numbers = #tpu.dot_dimension_numbers<[1], [0], [0], [1], [0, 0, 1, 1], [], []>} : vector<16x512xbf16>, vector<512x256xbf16>, vector<16x256xf32> -> vector<16x256xf32>
    %c0_9 = arith.constant 0 : index
    %c0_10 = arith.constant 0 : index
    %11 = vector.load %arg5[%c0_9, %c0_10] : memref<1x256xf32, #tpu.memory_space<vmem>>, vector<1x256xf32>
    %12 = vector.broadcast %11 : vector<1x256xf32> to vector<16x256xf32>
    %13 = arith.addf %10, %12 : vector<16x256xf32>
    %cst_11 = arith.constant 0.000000e+00 : f32
    %14 = vector.broadcast %cst_11 : f32 to vector<16x256xf32>
    %15 = arith.maximumf %13, %14 : vector<16x256xf32>
    %16 = arith.truncf %15 : vector<16x256xf32> to vector<16x256xbf16>
    %c0_12 = arith.constant 0 : index
    %c0_13 = arith.constant 0 : index
    %17 = vector.load %arg6[%c0_12, %c0_13] : memref<256x128xbf16, #tpu.memory_space<vmem>>, vector<256x128xbf16>
    %cst_14 = arith.constant dense<0.000000e+00> : vector<16x128xf32>
    %18 = tpu.matmul %16, %17, %cst_14 {dimension_numbers = #tpu.dot_dimension_numbers<[1], [0], [0], [1], [0, 0, 1, 1], [], []>} : vector<16x256xbf16>, vector<256x128xbf16>, vector<16x128xf32> -> vector<16x128xf32>
    %c0_15 = arith.constant 0 : index
    %c0_16 = arith.constant 0 : index
    %19 = vector.load %arg7[%c0_15, %c0_16] : memref<1x128xf32, #tpu.memory_space<vmem>>, vector<1x128xf32>
    %20 = vector.broadcast %19 : vector<1x128xf32> to vector<16x128xf32>
    %21 = arith.addf %18, %20 : vector<16x128xf32>
    %cst_17 = arith.constant 0.000000e+00 : f32
    %22 = vector.broadcast %cst_17 : f32 to vector<16x128xf32>
    %23 = arith.maximumf %21, %22 : vector<16x128xf32>
    %24 = arith.truncf %23 : vector<16x128xf32> to vector<16x128xbf16>
    %c0_18 = arith.constant 0 : index
    %c0_19 = arith.constant 0 : index
    %25 = vector.load %arg8[%c0_18, %c0_19] : memref<128x128xbf16, #tpu.memory_space<vmem>>, vector<128x128xbf16>
    %cst_20 = arith.constant dense<0.000000e+00> : vector<16x128xf32>
    %26 = tpu.matmul %24, %25, %cst_20 {dimension_numbers = #tpu.dot_dimension_numbers<[1], [0], [0], [1], [0, 0, 1, 1], [], []>} : vector<16x128xbf16>, vector<128x128xbf16>, vector<16x128xf32> -> vector<16x128xf32>
    %c0_21 = arith.constant 0 : index
    %c0_22 = arith.constant 0 : index
    %27 = vector.load %arg9[%c0_21, %c0_22] : memref<1x128xf32, #tpu.memory_space<vmem>>, vector<1x128xf32>
    %28 = vector.broadcast %27 : vector<1x128xf32> to vector<16x128xf32>
    %29 = arith.addf %26, %28 : vector<16x128xf32>
    %cst_23 = arith.constant 0.000000e+00 : f32
    %30 = vector.broadcast %cst_23 : f32 to vector<16x128xf32>
    %31 = arith.maximumf %29, %30 : vector<16x128xf32>
    %32 = arith.truncf %31 : vector<16x128xf32> to vector<16x128xbf16>
    %c0_24 = arith.constant 0 : index
    %c0_25 = arith.constant 0 : index
    %33 = vector.load %arg10[%c0_24, %c0_25] : memref<128x128xbf16, #tpu.memory_space<vmem>>, vector<128x128xbf16>
    %cst_26 = arith.constant dense<0.000000e+00> : vector<16x128xf32>
    %34 = tpu.matmul %32, %33, %cst_26 {dimension_numbers = #tpu.dot_dimension_numbers<[1], [0], [0], [1], [0, 0, 1, 1], [], []>} : vector<16x128xbf16>, vector<128x128xbf16>, vector<16x128xf32> -> vector<16x128xf32>
    %c0_27 = arith.constant 0 : index
    %c0_28 = arith.constant 0 : index
    %35 = vector.load %arg11[%c0_27, %c0_28] : memref<1x128xf32, #tpu.memory_space<vmem>>, vector<1x128xf32>
    %36 = vector.broadcast %35 : vector<1x128xf32> to vector<16x128xf32>
    %37 = arith.addf %34, %36 : vector<16x128xf32>
    %38 = arith.truncf %37 : vector<16x128xf32> to vector<16x128xbf16>
    %c0_29 = arith.constant 0 : index
    %c0_30 = arith.constant 0 : index
    %39 = vector.load %arg12[%c0_29, %c0_30] : memref<16x128xbf16, #tpu.memory_space<vmem>>, vector<16x128xbf16>
    tpu.vector_store %arg12[%c0_29, %c0_30], %38 {strides = array<i32>} : memref<16x128xbf16, #tpu.memory_space<vmem>>, vector<16x128xbf16>,
    return
  }
  func.func @transform_0(%arg0: i32) -> (i32, i32) {
    %c0_i32 = arith.constant 0 : i32
    %c0_i32_0 = arith.constant 0 : i32
    return %arg0, %c0_i32 : i32, i32
  }
  func.func @transform_1(%arg0: i32) -> (i32, i32) {
    %c0_i32 = arith.constant 0 : i32
    %c0_i32_0 = arith.constant 0 : i32
    %c0_i32_1 = arith.constant 0 : i32
    return %c0_i32, %c0_i32_0 : i32, i32
  }
  func.func @transform_2(%arg0: i32) -> (i32, i32) {
    %c0_i32 = arith.constant 0 : i32
    %c0_i32_0 = arith.constant 0 : i32
    %c0_i32_1 = arith.constant 0 : i32
    return %c0_i32, %c0_i32_0 : i32, i32
  }
  func.func @transform_3(%arg0: i32) -> (i32, i32) {
    %c0_i32 = arith.constant 0 : i32
    %c0_i32_0 = arith.constant 0 : i32
    %c0_i32_1 = arith.constant 0 : i32
    return %c0_i32, %c0_i32_0 : i32, i32
  }
  func.func @transform_4(%arg0: i32) -> (i32, i32) {
    %c0_i32 = arith.constant 0 : i32
    %c0_i32_0 = arith.constant 0 : i32
    %c0_i32_1 = arith.constant 0 : i32
    return %c0_i32, %c0_i32_0 : i32, i32
  }
  func.func @transform_5(%arg0: i32) -> (i32, i32) {
    %c0_i32 = arith.constant 0 : i32
    %c0_i32_0 = arith.constant 0 : i32
    %c0_i32_1 = arith.constant 0 : i32
    return %c0_i32, %c0_i32_0 : i32, i32
  }
  func.func @transform_6(%arg0: i32) -> (i32, i32) {
    %c0_i32 = arith.constant 0 : i32
    %c0_i32_0 = arith.constant 0 : i32
    %c0_i32_1 = arith.constant 0 : i32
    return %c0_i32, %c0_i32_0 : i32, i32
  }
  func.func @transform_7(%arg0: i32) -> (i32, i32) {
    %c0_i32 = arith.constant 0 : i32
    %c0_i32_0 = arith.constant 0 : i32
    %c0_i32_1 = arith.constant 0 : i32
    return %c0_i32, %c0_i32_0 : i32, i32
  }
  func.func @transform_8(%arg0: i32) -> (i32, i32) {
    %c0_i32 = arith.constant 0 : i32
    %c0_i32_0 = arith.constant 0 : i32
    %c0_i32_1 = arith.constant 0 : i32
    return %c0_i32, %c0_i32_0 : i32, i32
  }
  func.func @transform_9(%arg0: i32) -> (i32, i32) {
    %c0_i32 = arith.constant 0 : i32
    %c0_i32_0 = arith.constant 0 : i32
    %c0_i32_1 = arith.constant 0 : i32
    return %c0_i32, %c0_i32_0 : i32, i32
  }
  func.func @transform_10(%arg0: i32) -> (i32, i32) {
    %c0_i32 = arith.constant 0 : i32
    %c0_i32_0 = arith.constant 0 : i32
    %c0_i32_1 = arith.constant 0 : i32
    return %c0_i32, %c0_i32_0 : i32, i32
  }
  func.func @transform_11(%arg0: i32) -> (i32, i32) {
    %c0_i32 = arith.constant 0 : i32
    %c0_i32_0 = arith.constant 0 : i32
    return %arg0, %c0_i32 : i32, i32
  }
}

</mosaic_0001>

<bundles_post_ra>
// kernel: tpu_custom_call.1
= control target key start
LH: loop header
LB: loop body
LE: loop exit
PB: predicated region body
PF: predicated region fallthrough
CT: control target
= control target key end

     0   :  { %16 = vsyncpa [#allocation3], 0  ;;  %s2183_s0 = inlined_call_operand.hbm [shape: bf16[16,128], index: 0, kind: input, shape index: {}]   ;;  %s2184_s1 = inlined_call_operand.hbm [shape: bf16[128,512], index: 1, kind: input, shape index: {}]   ;;  %s2185_s2 = inlined_call_operand.vmem [shape: f32[1,512], index: 2, kind: input, shape index: {}]   ;;  %s2186_s3 = inlined_call_operand.hbm [shape: bf16[512,256], index: 3, kind: input, shape index: {}]   ;;  %s2187_s4 = inlined_call_operand.vmem [shape: f32[1,256], index: 4, kind: input, shape index: {}]   ;;  %s2188_s5 = inlined_call_operand.hbm [shape: bf16[256,128], index: 5, kind: input, shape index: {}]   ;;  %s2189_s6 = inlined_call_operand.vmem [shape: f32[1,128], index: 6, kind: input, shape index: {}]   ;;  %s2190_s7 = inlined_call_operand.hbm [shape: bf16[128,128], index: 7, kind: input, shape index: {}]   ;;  %s2191_s8 = inlined_call_operand.vmem [shape: f32[1,128], index: 8, kind: input, shape index: {}]   ;;  %s2192_s9 = inlined_call_operand.hbm [shape: bf16[128,128], index: 9, kind: input, shape index: {}]   ;;  %s2193_s10 = inlined_call_operand.vmem [shape: f32[1,128], index: 10, kind: input, shape index: {}]   ;;  %s2194_s11 = inlined_call_operand.hbm [shape: bf16[16,128], index: 11, kind: output, shape index: {}]  }
   0x1   :  { %17 = vsyncpa [#allocation6], 0 }
   0x2   :  { %18 = vsyncpa [#allocation9], 0 }
   0x3   :  { %19 = vsyncpa [#allocation12], 0 }
   0x4   :  { %20 = vsyncpa [#allocation4], 0  ;;  %s1952_s17 = smov [#allocation5]   ;;  %s1788_s21 = scalar_lea.hbm %s2184_s1, 4096 }
   0x5   :  { %s38_s18 = sshll.u32 %s1952_s17, 4  ;;  %p1789_p0 = scmp.ne.s32.totalorder %s2184_s1, %s1788_s21  ;;  %s39_s18 = int_to_ptr.vmem [resolvable:$true] %s38_s18 }
   0x6   :  { %p1792_p1 = scmp.lt.u32.totalorder %s1788_s21, %s2184_s1 }
   0x8   :  { %p1794_p2 = pnand %p1792_p1, %p1789_p0 }
   0xa   :  { %1797 = shalt.err (!%p1794_p2)
}
   0xb   :  { %s1798_s26 = scalar_lea.vmem %s39_s18, 4096  ;;  %p1803_p4 = scmp.lt.s32.totalorder %s39_s18, %s39_s18 }
   0xc   :  { %p1799_p3 = scmp.ne.s32.totalorder %s39_s18, %s1798_s26  ;;  %p1804_p5 = scmp.lt.s32.totalorder %s1798_s26, %s1798_s26 }
   0xe   :  { %p1805_p6 = por %p1804_p5, %p1803_p4 }
  0x10   :  { %p1806_p7 = pnand %p1805_p6, %p1799_p3 }
  0x12   :  { %1809 = shalt.err (!%p1806_p7)
}
  0x13   :  { %s1953_s27 = smov 256   ;;  %s1954_s28 = smov 16  }
  0x14   :  { %44 = dma.hbm_to_vmem [thread:$0]  %s2184_s1, 4096, %s39_s18, [#allocation6], %s1953_s27, %s1953_s27, %s1954_s28  }
  0x15   :  { %s1955_s12 = smov [#allocation8]   ;;  %s1956_s14 = smov [#allocation2]  }
  0x16   :  { %s66_s13 = sshll.u32 %s1955_s12, 4  ;;  %s26_s15 = sshll.u32 %s1956_s14, 4  ;;  %s67_s13 = int_to_ptr.vmem [resolvable:$true] %s66_s13  ;;  %s27_s15 = int_to_ptr.vmem [resolvable:$true] %s26_s15 }
  0x17   :  { %s1810_s19 = scalar_lea.hbm %s2188_s5, 2048 }
  0x18   :  { %p1811_p8 = scmp.ne.s32.totalorder %s2188_s5, %s1810_s19  ;;  %p1814_p9 = scmp.lt.u32.totalorder %s1810_s19, %s2188_s5 }
  0x1a   :  { %p1816_p10 = pnand %p1814_p9, %p1811_p8 }
  0x1c   :  { %1819 = shalt.err (!%p1816_p10)
}
  0x1d   :  { %s1820_s1 = scalar_lea.vmem %s67_s13, 2048  ;;  %p1825_p12 = scmp.lt.s32.totalorder %s67_s13, %s67_s13 }
  0x1e   :  { %p1821_p11 = scmp.ne.s32.totalorder %s67_s13, %s1820_s1  ;;  %p1826_p13 = scmp.lt.s32.totalorder %s1820_s1, %s1820_s1 }
  0x20   :  { %p1827_p0 = por %p1826_p13, %p1825_p12 }
  0x22   :  { %p1828_p1 = pnand %p1827_p0, %p1821_p11 }
  0x24   :  { %1831 = shalt.err (!%p1828_p1)
}
  0x25   :  { %s1957_s18 = smov 64   ;;  %s1958_s24 = smov 4  }
  0x26   :  { %72 = dma.hbm_to_vmem [thread:$0]  %s2188_s5, 2048, %s67_s13, [#allocation9], %s1957_s18, %s1957_s18, %s1958_s24  }
  0x27   :  { %s1832_s29 = scalar_lea.hbm %s2183_s0, 128 }
  0x28   :  { %p1833_p2 = scmp.ne.s32.totalorder %s2183_s0, %s1832_s29  ;;  %p1836_p3 = scmp.lt.u32.totalorder %s1832_s29, %s2183_s0 }
  0x2a   :  { %p1838_p4 = pnand %p1836_p3, %p1833_p2 }
  0x2c   :  { %1841 = shalt.err (!%p1838_p4)
}
  0x2d   :  { %s1842_s17 = scalar_lea.vmem %s27_s15, 128  ;;  %p1847_p6 = scmp.lt.s32.totalorder %s27_s15, %s27_s15 }
  0x2e   :  { %p1843_p5 = scmp.ne.s32.totalorder %s27_s15, %s1842_s17  ;;  %p1848_p7 = scmp.lt.s32.totalorder %s1842_s17, %s1842_s17 }
  0x30   :  { %p1849_p8 = por %p1848_p7, %p1847_p6 }
  0x32   :  { %p1850_p9 = pnand %p1849_p8, %p1843_p5 }
  0x34   :  { %1853 = shalt.err (!%p1850_p9)
}
  0x35   :  { %32 = dma.hbm_to_vmem [thread:$0]  %s2183_s0, 128, %s27_s15, [#allocation3], %s1957_s18, %s1957_s18, %s1958_s24  }
  0x36   :  { %s1959_s19 = smov [#allocation7]   ;;  %s1854_s23 = scalar_lea.hbm %s2186_s3, 8192 }
  0x37   :  { %s52_s20 = sshll.u32 %s1959_s19, 4  ;;  %p1855_p10 = scmp.ne.s32.totalorder %s2186_s3, %s1854_s23  ;;  %s53_s20 = int_to_ptr.vmem [resolvable:$true] %s52_s20 }
  0x38   :  { %p1858_p11 = scmp.lt.u32.totalorder %s1854_s23, %s2186_s3 }
  0x3a   :  { %p1860_p12 = pnand %p1858_p11, %p1855_p10 }
  0x3c   :  { %1863 = shalt.err (!%p1860_p12)
}
  0x3d   :  { %s1864_s28 = scalar_lea.vmem %s53_s20, 8192  ;;  %p1869_p0 = scmp.lt.s32.totalorder %s53_s20, %s53_s20 }
  0x3e   :  { %p1865_p13 = scmp.ne.s32.totalorder %s53_s20, %s1864_s28  ;;  %p1870_p1 = scmp.lt.s32.totalorder %s1864_s28, %s1864_s28 }
  0x40   :  { %p1871_p2 = por %p1870_p1, %p1869_p0 }
  0x42   :  { %p1872_p3 = pnand %p1871_p2, %p1865_p13 }
  0x44   :  { %1875 = shalt.err (!%p1872_p3)
}
  0x45   :  { %s1960_s0 = smov 128   ;;  %s1961_s15 = smov 8  }
  0x46   :  { %58 = dma.hbm_to_vmem [thread:$0]  %s2186_s3, 8192, %s53_s20, [#allocation6], %s1960_s0, %s1960_s0, %s1961_s15  }
  0x47   :  { %s1962_s12 = smov [#allocation10]   ;;  %s1963_s16 = smov [#allocation11]  }
  0x48   :  { %s80_s14 = sshll.u32 %s1962_s12, 4  ;;  %s94_s17 = sshll.u32 %s1963_s16, 4  ;;  %s81_s14 = int_to_ptr.vmem [resolvable:$true] %s80_s14  ;;  %s2082_s17 = int_to_ptr.vmem [resolvable:$true] %s94_s17 }
  0x49   :  { %s1876_s19 = scalar_lea.hbm %s2190_s7, 1024 }
  0x4a   :  { %p1877_p4 = scmp.ne.s32.totalorder %s2190_s7, %s1876_s19  ;;  %p1880_p5 = scmp.lt.u32.totalorder %s1876_s19, %s2190_s7 }
  0x4c   :  { %p1882_p6 = pnand %p1880_p5, %p1877_p4 }
  0x4e   :  { %1885 = shalt.err (!%p1882_p6)
}
  0x4f   :  { %s1886_s3 = scalar_lea.vmem %s81_s14, 1024  ;;  %p1891_p8 = scmp.lt.s32.totalorder %s81_s14, %s81_s14 }
  0x50   :  { %p1887_p7 = scmp.ne.s32.totalorder %s81_s14, %s1886_s3  ;;  %p1892_p9 = scmp.lt.s32.totalorder %s1886_s3, %s1886_s3 }
  0x52   :  { %p1893_p10 = por %p1892_p9, %p1891_p8 }
  0x54   :  { %p1894_p11 = pnand %p1893_p10, %p1887_p7 }
  0x56   :  { %1897 = shalt.err (!%p1894_p11)
}
  0x57   :  { %86 = dma.hbm_to_vmem [thread:$0]  %s2190_s7, 1024, %s81_s14, [#allocation9], %s1957_s18, %s1957_s18, %s1958_s24  }
  0x58   :  { %s1898_s28 = scalar_lea.hbm %s2192_s9, 1024 }
  0x59   :  { %p1899_p12 = scmp.ne.s32.totalorder %s2192_s9, %s1898_s28  ;;  %p1902_p13 = scmp.lt.u32.totalorder %s1898_s28, %s2192_s9 }
  0x5b   :  { %p1904_p0 = pnand %p1902_p13, %p1899_p12 }
  0x5d   :  { %1907 = shalt.err (!%p1904_p0)
}
  0x5e   :  { %s1908_s12 = scalar_lea.vmem %s2082_s17, 1024  ;;  %p1913_p2 = scmp.lt.s32.totalorder %s2082_s17, %s2082_s17 }
  0x5f   :  { %p1909_p1 = scmp.ne.s32.totalorder %s2082_s17, %s1908_s12  ;;  %p1914_p3 = scmp.lt.s32.totalorder %s1908_s12, %s1908_s12 }
  0x61   :  { %p1915_p4 = por %p1914_p3, %p1913_p2 }
  0x63   :  { %p1916_p5 = pnand %p1915_p4, %p1909_p1 }
  0x65   :  { %1919 = shalt.err (!%p1916_p5)
}
  0x66   :  { %100 = dma.hbm_to_vmem [thread:$0]  %s2192_s9, 1024, %s2082_s17, [#allocation12], %s1957_s18, %s1957_s18, %s1958_s24  }
  0x67   :  { %1942 = dma.done.wait [#allocation3], 128  }
  0x68   :  { %1943 = vsyncadd [#allocation3], 4294967168 }
  0x69   :  { %1944 = dma.done.wait [#allocation6], 12288  }
  0x6a   :  { %1945 = vsyncadd [#allocation6], 4294955008 }
  0x6b   :  { %1946 = dma.done.wait [#allocation9], 3072  }
  0x6c   :  { %1947 = vsyncadd [#allocation9], 4294964224 }
  0x6d   :  { %1948 = dma.done.wait [#allocation12], 1024  }
  0x6e   :  { %1949 = vsyncadd [#allocation12], 4294966272  ;;  %v1964_v0 = vmov 0   ;;  %v1611_v1 = vld [vmem:[#allocation5 + $0x4] ss:$16 sps:$4 sm:$0xff]   ;;  %v1635_v29 = vld [vmem:[#allocation2] sm:$0xff]  }
  0x6f   :  { %376 = vmatprep.mubr.bf16.mxu0 %v1964_v0  ;;  %419 = vmatprep.mubr.bf16.mxu1 %v1964_v0  ;;  %v1613_v2 = vld [vmem:[#allocation5] ss:$16 sps:$4 sm:$0xff]   ;;  %v1614_v3 = vld [vmem:[#allocation5 + $0x24] ss:$16 sps:$4 sm:$0xff]   ;;  %v1636_v10 = vld [vmem:[#allocation5 + $0xc] ss:$16 sps:$4 sm:$0xff]  }
  0x70   :  { %344 = vmatprep.subr.bf16.mxu0 %v1611_v1  ;;  %v1616_v4 = vld [vmem:[#allocation5 + $0x20] ss:$16 sps:$4 sm:$0xff]   ;;  %v1617_v5 = vld [vmem:[#allocation5 + $0x44] ss:$16 sps:$4 sm:$0xff]   ;;  %v1638_v11 = vld [vmem:[#allocation5 + $0x8] ss:$16 sps:$4 sm:$0xff]   ;;  %387 = vmatprep.subr.bf16.mxu1 %v1636_v10 }
  0x71   :  { %345 = vmatpush1.bf16.msra.mxu0 %v1613_v2  ;;  %v1619_v6 = vld [vmem:[#allocation5 + $0x40] ss:$16 sps:$4 sm:$0xff]   ;;  %v1620_v7 = vld [vmem:[#allocation5 + $0x64] ss:$16 sps:$4 sm:$0xff]   ;;  %v1639_v12 = vld [vmem:[#allocation5 + $0x2c] ss:$16 sps:$4 sm:$0xff]   ;;  %388 = vmatpush1.bf16.msra.mxu1 %v1638_v11 }
  0x72   :  { %346 = vmatprep.subr.bf16.mxu0 %v1614_v3  ;;  %v1622_v8 = vld [vmem:[#allocation5 + $0x60] ss:$16 sps:$4 sm:$0xff]   ;;  %v1623_v9 = vld [vmem:[#allocation5 + $0x84] ss:$16 sps:$4 sm:$0xff]   ;;  %v1641_v14 = vld [vmem:[#allocation5 + $0x28] ss:$16 sps:$4 sm:$0xff]   ;;  %389 = vmatprep.subr.bf16.mxu1 %v1639_v12 }
  0x73   :  { %v1625_v13 = vld [vmem:[#allocation5 + $0x80] ss:$16 sps:$4 sm:$0xff]   ;;  %v1626_v15 = vld [vmem:[#allocation5 + $0xa4] ss:$16 sps:$4 sm:$0xff]   ;;  %v1642_v16 = vld [vmem:[#allocation5 + $0x4c] ss:$16 sps:$4 sm:$0xff]  }
  0x74   :  { %v1628_v17 = vld [vmem:[#allocation5 + $0xa0] ss:$16 sps:$4 sm:$0xff]   ;;  %v1644_v18 = vld [vmem:[#allocation5 + $0x48] ss:$16 sps:$4 sm:$0xff]   ;;  %v1629_v19 = vld [vmem:[#allocation5 + $0xc4] ss:$16 sps:$4 sm:$0xff]  }
  0x75   :  { %347 = vmatpush1.bf16.msra.mxu0 %v1616_v4  ;;  %390 = vmatpush1.bf16.msra.mxu1 %v1641_v14  ;;  %v1645_v20 = vld [vmem:[#allocation5 + $0x6c] ss:$16 sps:$4 sm:$0xff]   ;;  %v1631_v21 = vld [vmem:[#allocation5 + $0xc0] ss:$16 sps:$4 sm:$0xff]   ;;  %v1647_v22 = vld [vmem:[#allocation5 + $0x68] ss:$16 sps:$4 sm:$0xff]   ;;  %v158_v14 = vlaneseq }
  0x76   :  { %348 = vmatprep.subr.bf16.mxu0 %v1617_v5  ;;  %391 = vmatprep.subr.bf16.mxu1 %v1642_v16  ;;  %v1632_v23 = vld [vmem:[#allocation5 + $0xe4] ss:$16 sps:$4 sm:$0xff]   ;;  %v1648_v24 = vld [vmem:[#allocation5 + $0x8c] ss:$16 sps:$4 sm:$0xff]   ;;  %v1634_v25 = vld [vmem:[#allocation5 + $0xe0] ss:$16 sps:$4 sm:$0xff]  }
  0x77   :  { %v1650_v26 = vld [vmem:[#allocation5 + $0x88] ss:$16 sps:$4 sm:$0xff]   ;;  %v1651_v27 = vld [vmem:[#allocation5 + $0xac] ss:$16 sps:$4 sm:$0xff]   ;;  %v1756_v3 = vld [vmem:[#allocation8 + $0x40] sm:$0xff]   ;;  %vm1966_vm0 = vmmov 0  }
  0x78   :  { %v1662_v28 = vld [vmem:[#allocation7 + $0x4] ss:$8 sps:$4 sm:$0xff]   ;;  %v1653_v30 = vld [vmem:[#allocation5 + $0xa8] ss:$16 sps:$4 sm:$0xff]   ;;  %v1665_v33 = vld [vmem:[#allocation7 + $0x14] ss:$8 sps:$4 sm:$0xff]  }
  0x79   :  { %349 = vmatpush1.bf16.msra.mxu0 %v1619_v6  ;;  %392 = vmatpush1.bf16.msra.mxu1 %v1644_v18  ;;  %v1660_v31 = vld [vmem:[#allocation7] ss:$8 sps:$4 sm:$0xff]   ;;  %v1654_v32 = vld [vmem:[#allocation5 + $0xcc] ss:$16 sps:$4 sm:$0xff]   ;;  %v1663_v35 = vld [vmem:[#allocation7 + $0x10] ss:$8 sps:$4 sm:$0xff]  }
  0x7a   :  { %350 = vmatprep.subr.bf16.mxu0 %v1620_v7  ;;  %393 = vmatprep.subr.bf16.mxu1 %v1645_v20  ;;  %v1656_v34 = vld [vmem:[#allocation5 + $0xc8] ss:$16 sps:$4 sm:$0xff]   ;;  %v1657_v36 = vld [vmem:[#allocation5 + $0xec] ss:$16 sps:$4 sm:$0xff]   ;;  %v1757_v4 = vld [vmem:[#allocation8] sm:$0xff]   ;;  %s1967_s22 = smov [#allocation13]  }
  0x7b   :  { %v1668_v37 = vld [vmem:[#allocation7 + $0x24] ss:$8 sps:$4 sm:$0xff]   ;;  %v1659_v38 = vld [vmem:[#allocation5 + $0xe8] ss:$16 sps:$4 sm:$0xff]   ;;  %v1671_v40 = vld [vmem:[#allocation7 + $0x34] ss:$8 sps:$4 sm:$0xff]  }
  0x7c   :  { %v1666_v39 = vld [vmem:[#allocation7 + $0x20] ss:$8 sps:$4 sm:$0xff]   ;;  %v1669_v41 = vld [vmem:[#allocation7 + $0x30] ss:$8 sps:$4 sm:$0xff]   ;;  %v1674_v42 = vld [vmem:[#allocation7 + $0x44] ss:$8 sps:$4 sm:$0xff]  }
  0x7d   :  { %351 = vmatpush1.bf16.msra.mxu0 %v1622_v8  ;;  %394 = vmatpush1.bf16.msra.mxu1 %v1647_v22  ;;  %v1672_v43 = vld [vmem:[#allocation7 + $0x40] ss:$8 sps:$4 sm:$0xff]   ;;  %v1677_v44 = vld [vmem:[#allocation7 + $0x54] ss:$8 sps:$4 sm:$0xff]   ;;  %v1675_v45 = vld [vmem:[#allocation7 + $0x50] ss:$8 sps:$4 sm:$0xff]  }
  0x7e   :  { %352 = vmatprep.subr.bf16.mxu0 %v1623_v9  ;;  %395 = vmatprep.subr.bf16.mxu1 %v1648_v24  ;;  %v1680_v46 = vld [vmem:[#allocation7 + $0x64] ss:$8 sps:$4 sm:$0xff]   ;;  %v1678_v47 = vld [vmem:[#allocation7 + $0x60] ss:$8 sps:$4 sm:$0xff]   ;;  %v1683_v48 = vld [vmem:[#allocation7 + $0x74] ss:$8 sps:$4 sm:$0xff]  }
  0x7f   :  { %v1681_v49 = vld [vmem:[#allocation7 + $0x70] ss:$8 sps:$4 sm:$0xff]   ;;  %v1686_v50 = vld [vmem:[#allocation7 + $0x84] ss:$8 sps:$4 sm:$0xff]   ;;  %v1684_v51 = vld [vmem:[#allocation7 + $0x80] ss:$8 sps:$4 sm:$0xff]  }
  0x80   :  { %v1689_v52 = vld [vmem:[#allocation7 + $0x94] ss:$8 sps:$4 sm:$0xff]   ;;  %v1687_v53 = vld [vmem:[#allocation7 + $0x90] ss:$8 sps:$4 sm:$0xff]   ;;  %v1692_v54 = vld [vmem:[#allocation7 + $0xa4] ss:$8 sps:$4 sm:$0xff]  }
  0x81   :  { %353 = vmatpush1.bf16.msra.mxu0 %v1625_v13  ;;  %396 = vmatpush1.bf16.msra.mxu1 %v1650_v26  ;;  %v1690_v55 = vld [vmem:[#allocation7 + $0xa0] ss:$8 sps:$4 sm:$0xff]   ;;  %v1695_v56 = vld [vmem:[#allocation7 + $0xb4] ss:$8 sps:$4 sm:$0xff]   ;;  %v1693_v57 = vld [vmem:[#allocation7 + $0xb0] ss:$8 sps:$4 sm:$0xff]  }
  0x82   :  { %354 = vmatprep.subr.bf16.mxu0 %v1626_v15  ;;  %397 = vmatprep.subr.bf16.mxu1 %v1651_v27  ;;  %v1698_v58 = vld [vmem:[#allocation7 + $0xc4] ss:$8 sps:$4 sm:$0xff]   ;;  %v1696_v59 = vld [vmem:[#allocation7 + $0xc0] ss:$8 sps:$4 sm:$0xff]   ;;  %v1701_v60 = vld [vmem:[#allocation7 + $0xd4] ss:$8 sps:$4 sm:$0xff]  }
  0x83   :  { %v1699_v61 = vld [vmem:[#allocation7 + $0xd0] ss:$8 sps:$4 sm:$0xff]   ;;  %v1704_v62 = vld [vmem:[#allocation7 + $0xe4] ss:$8 sps:$4 sm:$0xff]   ;;  %v1702_v63 = vld [vmem:[#allocation7 + $0xe0] ss:$8 sps:$4 sm:$0xff]  }
  0x84   :  { %v1707_v0 = vld [vmem:[#allocation7 + $0xf4] ss:$8 sps:$4 sm:$0xff]   ;;  %v1705_v1 = vld [vmem:[#allocation7 + $0xf0] ss:$8 sps:$4 sm:$0xff]   ;;  %v1710_v2 = vld [vmem:[#allocation7 + $0x104] ss:$8 sps:$4 sm:$0xff]  }
  0x85   :  { %355 = vmatpush1.bf16.msra.mxu0 %v1628_v17  ;;  %398 = vmatpush1.bf16.msra.mxu1 %v1653_v30  ;;  %v1758_v5 = vld [vmem:[#allocation8 + $0x48] sm:$0xff]   ;;  %v1760_v7 = vld [vmem:[#allocation8 + $0x50] sm:$0xff]   ;;  %v1762_v9 = vld [vmem:[#allocation8 + $0x58] sm:$0xff]   ;;  %v2119_v15 = vshrl.u32 %v158_v14, 7  ;;  %s1351_s23 = sshll.u32 %s1967_s22, 4  ;;  %s1352_s23 = int_to_ptr.vmem [resolvable:$true] %s1351_s23 }
  0x86   :  { %356 = vmatprep.subr.bf16.mxu0 %v1629_v19  ;;  %399 = vmatprep.subr.bf16.mxu1 %v1654_v32  ;;  %v1759_v6 = vld [vmem:[#allocation8 + $0x8] sm:$0xff]   ;;  %v1761_v8 = vld [vmem:[#allocation8 + $0x10] sm:$0xff]   ;;  %v1763_v10 = vld [vmem:[#allocation8 + $0x18] sm:$0xff]   ;;  %p1925_p7 = scmp.lt.s32.totalorder %s1352_s23, %s1352_s23 }
  0x87   :  { %v1764_v11 = vld [vmem:[#allocation8 + $0x60] sm:$0xff]   ;;  %v1766_v13 = vld [vmem:[#allocation8 + $0x68] sm:$0xff]   ;;  %v160_v16 = vsub.s32 0, %v2119_v15  ;;  %v156_v17 = vld [vmem:[%s2185_s2] sm:$0xf]  ;;  %v164_v18 = vsub.s32 1, %v2119_v15 }
  0x88   :  { %v1765_v12 = vld [vmem:[#allocation8 + $0x20] sm:$0xff]   ;;  %v1749_v14 = vld [vmem:[#allocation7 + $0x1d4] ss:$8 sps:$4 sm:$0xff]  }
  0x89   :  { %357 = vmatpush1.bf16.msra.mxu0 %v1631_v21  ;;  %400 = vmatpush1.bf16.msra.mxu1 %v1656_v34  ;;  %v161_v19 = vrot.slane %v156_v17, %v160_v16  ;;  %v165_v20 = vrot.slane %v156_v17, %v164_v18  ;;  %v172_v34 = vsub.s32 3, %v2119_v15 }
  0x8a   :  { %358 = vmatprep.subr.bf16.mxu0 %v1632_v23  ;;  %401 = vmatprep.subr.bf16.mxu1 %v1657_v36 }
  0x8d   :  { %359 = vmatpush1.bf16.msra.mxu0 %v1634_v25  ;;  %402 = vmatpush1.bf16.msra.mxu1 %v1659_v38  ;;  %v1713_v38 = vld [vmem:[#allocation7 + $0x114] ss:$8 sps:$4 sm:$0xff]  }
  0x8e   :  { %838 = vmatprep.subr.bf16.mxu0 %v1662_v28  ;;  %1507 = vmatprep.subr.bf16.mxu1 %v1756_v3  ;;  %v1729_v3 = vld [vmem:[#allocation7 + $0x170] ss:$8 sps:$4 sm:$0xff]  }
  0x90   :  { %377 = vmatmul.mubr.bf16.vlgmr.msra.gmra.mrb[0].mxu0 %v1635_v29  ;;  %420 = vmatmul.mubr.bf16.vlgmr.msra.gmra.mrb[0].mxu1 %v1635_v29 }
  0x91   :  { %839 = vmatpush1.bf16.msra.mxu0 %v1660_v31  ;;  %1508 = vmatpush3.bf16.msra.mxu1 %v1757_v4  ;;  %v168_v31 = vsub.s32 2, %v2119_v15  ;;  %v1734_v4 = vld [vmem:[#allocation7 + $0x184] ss:$8 sps:$4 sm:$0xff]  }
  0x92   :  { %840 = vmatprep.subr.bf16.mxu0 %v1665_v33  ;;  %1509 = vmatprep.subr.bf16.mxu1 %v1758_v5  ;;  %v1732_v5 = vld [vmem:[#allocation7 + $0x180] ss:$8 sps:$4 sm:$0xff]  }
  0x93   :  { %v1773_v15 = vld [vmem:[#allocation10 + $0x8] sm:$0xff]  }
  0x95   :  { %841 = vmatpush1.bf16.msra.mxu0 %v1663_v35  ;;  %1510 = vmatpush3.bf16.msra.mxu1 %v1759_v6  ;;  %v1737_v6 = vld [vmem:[#allocation7 + $0x194] ss:$8 sps:$4 sm:$0xff]  }
  0x96   :  { %842 = vmatprep.subr.bf16.mxu0 %v1668_v37  ;;  %1511 = vmatprep.subr.bf16.mxu1 %v1760_v7  ;;  %v1708_v37 = vld [vmem:[#allocation7 + $0x100] ss:$8 sps:$4 sm:$0xff]   ;;  %v1735_v7 = vld [vmem:[#allocation7 + $0x190] ss:$8 sps:$4 sm:$0xff]  }
  0x99   :  { %843 = vmatpush1.bf16.msra.mxu0 %v1666_v39  ;;  %1512 = vmatpush3.bf16.msra.mxu1 %v1761_v8  ;;  %v169_v39 = vrot.slane %v156_v17, %v168_v31  ;;  %v1740_v8 = vld [vmem:[#allocation7 + $0x1a4] ss:$8 sps:$4 sm:$0xff]  }
  0x9a   :  { %844 = vmatprep.subr.bf16.mxu0 %v1671_v40  ;;  %1513 = vmatprep.subr.bf16.mxu1 %v1762_v9  ;;  %v173_v40 = vrot.slane %v156_v17, %v172_v34  ;;  %v1738_v9 = vld [vmem:[#allocation7 + $0x1a0] ss:$8 sps:$4 sm:$0xff]   ;;  %v1747_v17 = vld [vmem:[#allocation7 + $0x1d0] ss:$8 sps:$4 sm:$0xff]  }
  0x9d   :  { %845 = vmatpush1.bf16.msra.mxu0 %v1669_v41  ;;  %1514 = vmatpush3.bf16.msra.mxu1 %v1763_v10  ;;  %v1711_v41 = vld [vmem:[#allocation7 + $0x110] ss:$8 sps:$4 sm:$0xff]   ;;  %v1743_v10 = vld [vmem:[#allocation7 + $0x1b4] ss:$8 sps:$4 sm:$0xff]  }
  0x9e   :  { %846 = vmatprep.subr.bf16.mxu0 %v1674_v42  ;;  %1515 = vmatprep.subr.bf16.mxu1 %v1764_v11  ;;  %v1741_v11 = vld [vmem:[#allocation7 + $0x1b0] ss:$8 sps:$4 sm:$0xff]  }
  0xa1   :  { %847 = vmatpush1.bf16.msra.mxu0 %v1672_v43  ;;  %1516 = vmatpush3.bf16.msra.mxu1 %v1765_v12  ;;  %v1716_v43 = vld [vmem:[#allocation7 + $0x124] ss:$8 sps:$4 sm:$0xff]  }
  0xa2   :  { %848 = vmatprep.subr.bf16.mxu0 %v1677_v44  ;;  %1517 = vmatprep.subr.bf16.mxu1 %v1766_v13  ;;  %v1746_v12 = vld [vmem:[#allocation7 + $0x1c4] ss:$8 sps:$4 sm:$0xff]   ;;  %v1744_v13 = vld [vmem:[#allocation7 + $0x1c0] ss:$8 sps:$4 sm:$0xff]  }
  0xa5   :  { %849 = vmatpush1.bf16.msra.mxu0 %v1675_v45 }
  0xa6   :  { %850 = vmatprep.subr.bf16.mxu0 %v1680_v46 }
  0xa9   :  { %851 = vmatpush1.bf16.msra.mxu0 %v1678_v47 }
  0xaa   :  { %852 = vmatprep.subr.bf16.mxu0 %v1683_v48 }
  0xad   :  { %853 = vmatpush1.bf16.msra.mxu0 %v1681_v49 }
  0xae   :  { %854 = vmatprep.subr.bf16.mxu0 %v1686_v50 }
  0xb1   :  { %855 = vmatpush1.bf16.msra.mxu0 %v1684_v51  ;;  %v1714_v51 = vld [vmem:[#allocation7 + $0x120] ss:$8 sps:$4 sm:$0xff]  }
  0xb2   :  { %856 = vmatprep.subr.bf16.mxu0 %v1689_v52 }
  0xb5   :  { %857 = vmatpush1.bf16.msra.mxu0 %v1687_v53 }
  0xb6   :  { %858 = vmatprep.subr.bf16.mxu0 %v1692_v54  ;;  %v1719_v54 = vld [vmem:[#allocation7 + $0x134] ss:$8 sps:$4 sm:$0xff]  }
  0xb9   :  { %859 = vmatpush1.bf16.msra.mxu0 %v1690_v55 }
  0xba   :  { %860 = vmatprep.subr.bf16.mxu0 %v1695_v56 }
  0xbd   :  { %861 = vmatpush1.bf16.msra.mxu0 %v1693_v57 }
  0xbe   :  { %862 = vmatprep.subr.bf16.mxu0 %v1698_v58  ;;  %v1717_v58 = vld [vmem:[#allocation7 + $0x130] ss:$8 sps:$4 sm:$0xff]  }
  0xc1   :  { %863 = vmatpush1.bf16.msra.mxu0 %v1696_v59 }
  0xc2   :  { %864 = vmatprep.subr.bf16.mxu0 %v1701_v60  ;;  %v1722_v60 = vld [vmem:[#allocation7 + $0x144] ss:$8 sps:$4 sm:$0xff]  }
  0xc5   :  { %865 = vmatpush1.bf16.msra.mxu0 %v1699_v61  ;;  %v1720_v61 = vld [vmem:[#allocation7 + $0x140] ss:$8 sps:$4 sm:$0xff]  }
  0xc6   :  { %866 = vmatprep.subr.bf16.mxu0 %v1704_v62  ;;  %v1725_v62 = vld [vmem:[#allocation7 + $0x154] ss:$8 sps:$4 sm:$0xff]  }
  0xc9   :  { %867 = vmatpush1.bf16.msra.mxu0 %v1702_v63  ;;  %v1723_v63 = vld [vmem:[#allocation7 + $0x150] ss:$8 sps:$4 sm:$0xff]  }
  0xca   :  { %868 = vmatprep.subr.bf16.mxu0 %v1707_v0  ;;  %v1728_v0 = vld [vmem:[#allocation7 + $0x164] ss:$8 sps:$4 sm:$0xff]  }
  0xcd   :  { %869 = vmatpush1.bf16.msra.mxu0 %v1705_v1  ;;  %v1726_v1 = vld [vmem:[#allocation7 + $0x160] ss:$8 sps:$4 sm:$0xff]  }
  0xce   :  { %881 = vmatprep.subr.bf16.mxu0 %v1710_v2  ;;  %v1731_v2 = vld [vmem:[#allocation7 + $0x174] ss:$8 sps:$4 sm:$0xff]  }
 0x163   :  { %v378_v21 = vpop.f32.mrb[0].mxu0  ;;  %v421_v42 = vpop.f32.mrb[0].mxu1 }
 0x164   :  { %v379_v22 = vadd.f32 %v378_v21, %v161_v19  ;;  %v380_v23 = vpop.f32.mrb[1].mxu0  ;;  %v422_v44 = vadd.f32 %v421_v42, %v169_v39  ;;  %v423_v45 = vpop.f32.mrb[1].mxu1  ;;  %v1755_v21 = vld [vmem:[#allocation7 + $0x1f4] ss:$8 sps:$4 sm:$0xff]  }
 0x165   :  { %v381_v24 = vadd.f32 %v380_v23, %v165_v20  ;;  %v382_v25 = vpop.f32.mrb[2].mxu0  ;;  %v424_v46 = vadd.f32 %v423_v45, %v173_v40  ;;  %v425_v47 = vpop.f32.mrb[2].mxu1  ;;  %v1767_v23 = vld [vmem:[#allocation8 + $0x28] sm:$0xff]  }
 0x166   :  { %v383_v26 = vadd.f32 %v382_v25, %v161_v19  ;;  %v384_v27 = vpop.f32.mrb[3].mxu0  ;;  %v430_v29 = vmax.f32 %v379_v22, 0.0  ;;  %v432_v48 = vmax.f32 %v422_v44, 0.0  ;;  %v426_v49 = vadd.f32 %v425_v47, %v169_v39  ;;  %v427_v50 = vpop.f32.mrb[3].mxu1  ;;  %v1752_v19 = vld [vmem:[#allocation7 + $0x1e4] ss:$8 sps:$4 sm:$0xff]   ;;  %1518 = vmatpush3.bf16.msra.mxu1 %v1767_v23 }
 0x167   :  { %v385_v28 = vadd.f32 %v384_v27, %v165_v20  ;;  %v431_v32 = vmax.f32 %v381_v24, 0.0  ;;  %v433_v52 = vmax.f32 %v424_v46, 0.0  ;;  %v428_v53 = vadd.f32 %v427_v50, %v173_v40  ;;  %v1750_v20 = vld [vmem:[#allocation7 + $0x1e0] ss:$8 sps:$4 sm:$0xff]   ;;  %v1753_v22 = vld [vmem:[#allocation7 + $0x1f0] ss:$8 sps:$4 sm:$0xff]  }
 0x168   :  { %v434_v30 = vmax.f32 %v383_v26, 0.0  ;;  %v436_v55 = vmax.f32 %v426_v49, 0.0  ;;  %v1768_v24 = vld [vmem:[#allocation8 + $0x70] sm:$0xff]   ;;  %v1770_v26 = vld [vmem:[#allocation8 + $0x78] sm:$0xff]   ;;  %v1772_v46 = vld [vmem:[#allocation10] sm:$0xff]  }
 0x169   :  { %v435_v33 = vmax.f32 %v385_v28, 0.0  ;;  %v437_v56 = vmax.f32 %v428_v53, 0.0  ;;  %v1769_v25 = vld [vmem:[#allocation8 + $0x30] sm:$0xff]   ;;  %1519 = vmatprep.subr.bf16.mxu1 %v1768_v24  ;;  %v1771_v27 = vld [vmem:[#allocation8 + $0x38] sm:$0xff]   ;;  %v1965_v28 = vmov 0.0   ;;  %v1776_v47 = vld [vmem:[#allocation10 + $0x20] sm:$0xff]  }
 0x16a   :  { %v438_v35 = vpack.c.bf16 %v434_v30, %v430_v29  ;;  %v440_v57 = vpack.c.bf16 %v436_v55, %v432_v48  ;;  %1520 = vmatpush3.bf16.msra.mxu1 %v1769_v25  ;;  %v506_v29 = vld [vmem:[%s2187_s4] sm:$0x3]  ;;  %v1777_v48 = vld [vmem:[#allocation10 + $0x28] sm:$0xff]   ;;  %v1778_v49 = vld [vmem:[#allocation10 + $0x30] sm:$0xff]  }
 0x16b   :  { %v439_v36 = vpack.c.bf16 %v435_v33, %v431_v32  ;;  %v441_v59 = vpack.c.bf16 %v437_v56, %v433_v52  ;;  %1521 = vmatprep.subr.bf16.mxu1 %v1770_v26  ;;  %v511_v30 = vrot.slane %v506_v29, %v160_v16  ;;  %v515_v31 = vrot.slane %v506_v29, %v164_v18  ;;  %v1774_v16 = vld [vmem:[#allocation10 + $0x10] sm:$0xff]   ;;  %v1775_v18 = vld [vmem:[#allocation10 + $0x18] sm:$0xff]  }
 0x16c   :  { %v1779_v50 = vld [vmem:[#allocation10 + $0x38] sm:$0xff]  }
 0x16d   :  { %870 = vmatprep.mubr.bf16.mxu0 %v439_v36  ;;  %v1463_v52 = vld [vmem:[%s2189_s6] ss:$0 sm:$0xff] }
 0x16e   :  { %871 = vmatmul.mubr.bf16.vlgmr.msra.gmra.mrb[4].mxu0 %v438_v35  ;;  %1522 = vmatpush3.bf16.msra.mxu1 %v1771_v27 }
 0x16f   :  { %882 = vmatpush1.bf16.msra.mxu0 %v1708_v37  ;;  %913 = vmatprep.mubr.bf16.mxu0 %v441_v59 }
 0x170   :  { %883 = vmatprep.subr.bf16.mxu0 %v1713_v38  ;;  %1547 = vmatprep.subr.bf16.mxu1 %v1965_v28 }
 0x173   :  { %884 = vmatpush1.bf16.msra.mxu0 %v1711_v41 }
 0x174   :  { %885 = vmatprep.subr.bf16.mxu0 %v1716_v43 }
 0x177   :  { %886 = vmatpush1.bf16.msra.mxu0 %v1714_v51 }
 0x178   :  { %887 = vmatprep.subr.bf16.mxu0 %v1719_v54 }
 0x17b   :  { %888 = vmatpush1.bf16.msra.mxu0 %v1717_v58 }
 0x17c   :  { %889 = vmatprep.subr.bf16.mxu0 %v1722_v60 }
 0x17f   :  { %890 = vmatpush1.bf16.msra.mxu0 %v1720_v61 }
 0x180   :  { %891 = vmatprep.subr.bf16.mxu0 %v1725_v62  ;;  %v1780_v62 = vld [vmem:[#allocation11] sm:$0xff]  }
 0x183   :  { %892 = vmatpush1.bf16.msra.mxu0 %v1723_v63 }
 0x184   :  { %893 = vmatprep.subr.bf16.mxu0 %v1728_v0  ;;  %v1781_v0 = vld [vmem:[#allocation11 + $0x8] sm:$0xff]  }
 0x187   :  { %894 = vmatpush1.bf16.msra.mxu0 %v1726_v1  ;;  %v1782_v1 = vld [vmem:[#allocation11 + $0x10] sm:$0xff]  }
 0x188   :  { %895 = vmatprep.subr.bf16.mxu0 %v1731_v2  ;;  %v1783_v2 = vld [vmem:[#allocation11 + $0x18] sm:$0xff]  }
 0x18b   :  { %896 = vmatpush1.bf16.msra.mxu0 %v1729_v3  ;;  %v1784_v3 = vld [vmem:[#allocation11 + $0x20] sm:$0xff]  }
 0x18c   :  { %897 = vmatprep.subr.bf16.mxu0 %v1734_v4  ;;  %v1785_v4 = vld [vmem:[#allocation11 + $0x28] sm:$0xff]  }
 0x18f   :  { %898 = vmatpush1.bf16.msra.mxu0 %v1732_v5  ;;  %v1786_v5 = vld [vmem:[#allocation11 + $0x30] sm:$0xff]  }
 0x190   :  { %899 = vmatprep.subr.bf16.mxu0 %v1737_v6  ;;  %v1787_v6 = vld [vmem:[#allocation11 + $0x38] sm:$0xff]  }
 0x193   :  { %900 = vmatpush1.bf16.msra.mxu0 %v1735_v7  ;;  %v1480_v7 = vld [vmem:[%s2191_s8] ss:$0 sm:$0xff]  ;;  %s1920_s8 = scalar_lea.vmem %s1352_s23, 128 }
 0x194   :  { %901 = vmatprep.subr.bf16.mxu0 %v1740_v8  ;;  %p1921_p6 = scmp.ne.s32.totalorder %s1352_s23, %s1920_s8  ;;  %p1926_p8 = scmp.lt.s32.totalorder %s1920_s8, %s1920_s8 }
 0x196   :  { %p1927_p9 = por %p1926_p8, %p1925_p7 }
 0x197   :  { %902 = vmatpush1.bf16.msra.mxu0 %v1738_v9 }
 0x198   :  { %903 = vmatprep.subr.bf16.mxu0 %v1743_v10  ;;  %p1928_p10 = pnand %p1927_p9, %p1921_p6 }
 0x19b   :  { %904 = vmatpush1.bf16.msra.mxu0 %v1741_v11 }
 0x19c   :  { %905 = vmatprep.subr.bf16.mxu0 %v1746_v12 }
 0x19f   :  { %906 = vmatpush1.bf16.msra.mxu0 %v1744_v13 }
 0x1a0   :  { %907 = vmatprep.subr.bf16.mxu0 %v1749_v14 }
 0x1a3   :  { %908 = vmatpush1.bf16.msra.mxu0 %v1747_v17 }
 0x1a4   :  { %909 = vmatprep.subr.bf16.mxu0 %v1752_v19 }
 0x1a7   :  { %910 = vmatpush1.bf16.msra.mxu0 %v1750_v20  ;;  %v1489_v20 = vld [vmem:[%s2193_s10] ss:$0 sm:$0xff] }
 0x1a8   :  { %911 = vmatprep.subr.bf16.mxu0 %v1755_v21 }
 0x1ab   :  { %912 = vmatpush1.bf16.msra.mxu0 %v1753_v22 }
 0x1ae   :  { %914 = vmatmul.mubr.bf16.vlgmr.msra.gmra.mrb[4].mxu0 %v440_v57 }
 0x281   :  { %v915_v32 = vpop.f32.mrb[4].mxu0 }
 0x282   :  { %v1587_v33 = vadd.f32 %v915_v32, %v511_v30  ;;  %v917_v34 = vpop.f32.mrb[5].mxu0 }
 0x283   :  { %v1588_v35 = vadd.f32 %v917_v34, %v515_v31  ;;  %v919_v36 = vpop.f32.mrb[6].mxu0 }
 0x284   :  { %v1589_v37 = vadd.f32 %v919_v36, %v511_v30  ;;  %v921_v38 = vpop.f32.mrb[7].mxu0  ;;  %v924_v40 = vmax.f32 %v1587_v33, 0.0 }
 0x285   :  { %v1590_v39 = vadd.f32 %v921_v38, %v515_v31  ;;  %v925_v42 = vmax.f32 %v1588_v35, 0.0 }
 0x286   :  { %v926_v41 = vmax.f32 %v1589_v37, 0.0 }
 0x287   :  { %v927_v43 = vmax.f32 %v1590_v39, 0.0 }
 0x288   :  { %v928_v44 = vpack.c.bf16 %v926_v41, %v924_v40 }
 0x289   :  { %v929_v45 = vpack.c.bf16 %v927_v43, %v925_v42 }
 0x28b   :  { %1097 = vmatprep.mubr.bf16.mxu1 %v929_v45 }
 0x28c   :  { %1098 = vmatmul.mubr.bf16.vlgmr.msra.gmra.mrb[4].mxu1 %v928_v44 }
 0x28d   :  { %1548 = vmatpush3.bf16.msra.mxu1 %v1772_v46  ;;  %1563 = vmatprep.mubr.msk.bf16.mxu1 %vm1966_vm0, %v1965_v28 }
 0x28e   :  { %1549 = vmatprep.subr.bf16.mxu1 %v1965_v28 }
 0x291   :  { %1550 = vmatpush3.bf16.msra.mxu1 %v1773_v15 }
 0x292   :  { %1551 = vmatprep.subr.bf16.mxu1 %v1965_v28 }
 0x295   :  { %1552 = vmatpush3.bf16.msra.mxu1 %v1774_v16 }
 0x296   :  { %1553 = vmatprep.subr.bf16.mxu1 %v1965_v28 }
 0x299   :  { %1554 = vmatpush3.bf16.msra.mxu1 %v1775_v18 }
 0x29a   :  { %1555 = vmatprep.subr.bf16.mxu1 %v1965_v28 }
 0x29d   :  { %1556 = vmatpush3.bf16.msra.mxu1 %v1776_v47 }
 0x29e   :  { %1557 = vmatprep.subr.bf16.mxu1 %v1965_v28 }
 0x2a1   :  { %1558 = vmatpush3.bf16.msra.mxu1 %v1777_v48 }
 0x2a2   :  { %1559 = vmatprep.subr.bf16.mxu1 %v1965_v28 }
 0x2a5   :  { %1560 = vmatpush3.bf16.msra.mxu1 %v1778_v49 }
 0x2a6   :  { %1561 = vmatprep.subr.bf16.mxu1 %v1965_v28 }
 0x2a9   :  { %1562 = vmatpush3.bf16.msra.mxu1 %v1779_v50 }
 0x2aa   :  { %1567 = vmatprep.subr.bf16.mxu1 %v1965_v28 }
 0x35f   :  { %v1523_v51 = vpop.f32.mrb[4].mxu1 }
 0x360   :  { %v1524_v53 = vpop.f32.mrb[5].mxu1 }
 0x361   :  { %v1525_v54 = vadd.f32 %v1524_v53, %v1523_v51  ;;  %v1526_v55 = vpop.f32.mrb[6].mxu1 }
 0x362   :  { %v1527_v56 = vpop.f32.mrb[7].mxu1 }
 0x363   :  { %v1100_v57 = vadd.f32 %v1525_v54, %v1463_v52  ;;  %v1528_v58 = vadd.f32 %v1527_v56, %v1526_v55 }
 0x365   :  { %v1103_v59 = vadd.f32 %v1528_v58, %v1463_v52  ;;  %v1106_v60 = vmax.f32 %v1100_v57, 0.0 }
 0x367   :  { %v1107_v61 = vmax.f32 %v1103_v59, 0.0 }
 0x369   :  { %v1108_v63 = vpack.c.bf16 %v1107_v61, %v1106_v60 }
 0x36b   :  { %1564 = vmatmul.mubr.bf16.vlgmr.msra.gmra.mrb[8].mxu1 %v1108_v63 }
 0x36c   :  { %1568 = vmatpush3.bf16.msra.mxu1 %v1780_v62  ;;  %1583 = vmatprep.mubr.msk.bf16.mxu1 %vm1966_vm0, %v1965_v28 }
 0x36d   :  { %1569 = vmatprep.subr.bf16.mxu1 %v1965_v28 }
 0x370   :  { %1570 = vmatpush3.bf16.msra.mxu1 %v1781_v0 }
 0x371   :  { %1571 = vmatprep.subr.bf16.mxu1 %v1965_v28 }
 0x374   :  { %1572 = vmatpush3.bf16.msra.mxu1 %v1782_v1 }
 0x375   :  { %1573 = vmatprep.subr.bf16.mxu1 %v1965_v28 }
 0x378   :  { %1574 = vmatpush3.bf16.msra.mxu1 %v1783_v2 }
 0x379   :  { %1575 = vmatprep.subr.bf16.mxu1 %v1965_v28 }
 0x37c   :  { %1576 = vmatpush3.bf16.msra.mxu1 %v1784_v3 }
 0x37d   :  { %1577 = vmatprep.subr.bf16.mxu1 %v1965_v28 }
 0x380   :  { %1578 = vmatpush3.bf16.msra.mxu1 %v1785_v4 }
 0x381   :  { %1579 = vmatprep.subr.bf16.mxu1 %v1965_v28 }
 0x384   :  { %1580 = vmatpush3.bf16.msra.mxu1 %v1786_v5 }
 0x385   :  { %1581 = vmatprep.subr.bf16.mxu1 %v1965_v28 }
 0x388   :  { %1582 = vmatpush3.bf16.msra.mxu1 %v1787_v6 }
 0x43e   :  { %v1214_v8 = vpop.f32.mrb[8].mxu1 }
 0x43f   :  { %v1215_v9 = vadd.f32 %v1480_v7, %v1214_v8  ;;  %v1565_v10 = vpop.f32.mrb[9].mxu1 }
 0x440   :  { %v1217_v11 = vpop.f32.mrb[10].mxu1 }
 0x441   :  { %v1218_v12 = vadd.f32 %v1480_v7, %v1217_v11  ;;  %v1566_v13 = vpop.f32.mrb[11].mxu1  ;;  %v1221_v14 = vmax.f32 %v1215_v9, 0.0 }
 0x443   :  { %v1222_v17 = vmax.f32 %v1218_v12, 0.0 }
 0x445   :  { %v1223_v19 = vpack.c.bf16 %v1222_v17, %v1221_v14 }
 0x447   :  { %1584 = vmatmul.mubr.bf16.vlgmr.msra.gmra.mrb[12].mxu1 %v1223_v19 }
 0x51a   :  { %v1329_v21 = vpop.f32.mrb[12].mxu1 }
 0x51b   :  { %v1585_v22 = vpop.f32.mrb[13].mxu1  ;;  %v1330_v24 = vadd.f32 %v1489_v20, %v1329_v21 }
 0x51c   :  { %v1332_v23 = vpop.f32.mrb[14].mxu1 }
 0x51d   :  { %v1333_v25 = vadd.f32 %v1489_v20, %v1332_v23  ;;  %v1586_v26 = vpop.f32.mrb[15].mxu1 }
 0x51f   :  { %v1505_v27 = vpack.c.bf16 %v1333_v25, %v1330_v24 }
 0x521   :  { %1506 = vst [vmem:[#allocation13] sm:$0xff] %v1505_v27  }
 0x522   :  { %1931 = shalt.err (!%p1928_p10)
}
 0x523   :  { %s1932_s3 = scalar_lea.hbm %s2194_s11, 128 }
 0x524   :  { %p1933_p11 = scmp.ne.s32.totalorder %s2194_s11, %s1932_s3  ;;  %p1936_p12 = scmp.lt.u32.totalorder %s1932_s3, %s2194_s11 }
 0x526   :  { %p1938_p13 = pnand %p1936_p12, %p1933_p11 }
 0x528   :  { %1941 = shalt.err (!%p1938_p13)
}
 0x529   :  { %1357 = dma.vmem_to_hbm [thread:$0]  %s1352_s23, 128, %s2194_s11, [#allocation4], %s1957_s18, %s1957_s18, %s1958_s24  }
 0x52a   :  { %1950 = dma.done.wait [#allocation4], 128  }
 0x52b   :  { %1951 = vsyncadd [#allocation4], 4294967168 }
 0x52c   :  { %1361 = vsyncpa [#allocation3], 1 }
 0x52d   :  { %1362 = vsyncpa [#allocation6], 1 }
 0x52e   :  { %1363 = vsyncpa [#allocation9], 1 }
 0x52f   :  { %1364 = vsyncpa [#allocation12], 1 }
 0x530   :  { %1365 = vsyncpa [#allocation4], 1 }

</bundles_post_ra>
